<compile_context>
chip_gen: v6e
topology: v6e:2x2x1
jax: 0.10.0
libtpu: 0.0.40
codegen_flags: <defaults>
</compile_context>

<pallas_src>
import jax
import jax.numpy as jnp
from jax.experimental import pallas as pl
from jax.experimental.pallas import tpu as pltpu

_EPS = 1e-8
_EPS_SQ = _EPS * _EPS


def _pick_row_tile(n, d, itemsize, vmem_budget_bytes=8 * 1024 * 1024):
    """Largest row tile s.t. 4 inputs x 2 buffers x tm x d x itemsize <= budget,
    tm divides n, and tm is a multiple of 8 (or tm == n)."""
    max_tm = max(1, vmem_budget_bytes // (4 * 2 * d * itemsize))
    tm = min(n, int(max_tm))
    for t in range(tm, 0, -1):
        if n % t == 0 and (t % 8 == 0 or t == n):
            return t
    return n  # fallback: full-extent block (always layout-legal)


def _make_kernel(scale):
    """scale = -0.5 / N, folded into a single finalize-time multiply."""

    def kernel(p1_ref, z2_ref, p2_ref, z1_ref, out_ref, acc_ref):
        i = pl.program_id(0)

        @pl.when(i == 0)
        def _():
            acc_ref[...] = jnp.zeros_like(acc_ref)

        def pair_cos(p_ref, z_ref):
            p = p_ref[...].astype(jnp.float32)
            z = z_ref[...].astype(jnp.float32)
            dot = jnp.sum(p * z, axis=-1, keepdims=True)     # (tm, 1)
            p_sq = jnp.sum(p * p, axis=-1, keepdims=True)    # (tm, 1)
            z_sq = jnp.sum(z * z, axis=-1, keepdims=True)    # (tm, 1)
            denom_sq = jnp.maximum(p_sq, _EPS_SQ) * jnp.maximum(z_sq, _EPS_SQ)
            # exact rsqrt on the EUP; equivalent to dot / (max(|p|,eps)*max(|z|,eps))
            return dot * jax.lax.rsqrt(denom_sq)              # (tm, 1)

        cos_sum_rows = pair_cos(p1_ref, z2_ref) + pair_cos(p2_ref, z1_ref)  # (tm, 1)
        acc_ref[...] += jnp.sum(cos_sum_rows, axis=0, keepdims=True)        # (1, 1)

        @pl.when(i == pl.num_programs(0) - 1)
        def _():
            out_ref[...] = acc_ref[...] * scale

    return kernel


def byol_loss(p1, z1, p2, z2):
    """BYOLLoss.forward(p1, z1, p2, z2) with version='simplified'."""
    assert p1.shape == z1.shape == p2.shape == z2.shape
    n, d = p1.shape
    itemsize = jnp.dtype(p1.dtype).itemsize
    tm = _pick_row_tile(n, d, itemsize)
    grid = (n // tm,)

    in_spec = pl.BlockSpec((tm, d), lambda i: (i, 0))
    out_spec = pl.BlockSpec((1, 1), lambda i: (0, 0))

    cost = pl.CostEstimate(
        flops=int(12 * n * d),          # 2 pairs x (3 muls + 3 adds) per element
        transcendentals=int(2 * n),     # one rsqrt per row per pair
        bytes_accessed=int(4 * n * d * itemsize + 4),
    )

    out = pl.pallas_call(
        _make_kernel(-0.5 / n),
        out_shape=jax.ShapeDtypeStruct((1, 1), jnp.float32),
        grid=grid,
        in_specs=[in_spec, in_spec, in_spec, in_spec],
        out_specs=out_spec,
        scratch_shapes=[pltpu.VMEM((1, 1), jnp.float32)],
        compiler_params=pltpu.CompilerParams(
            dimension_semantics=("arbitrary",),
        ),
        cost_estimate=cost,
    )(p1, z2, p2, z1)
    return out[0, 0]


if __name__ == "__main__":
    key = jax.random.PRNGKey(0)
    k1, k2, k3, k4 = jax.random.split(key, 4)

    # Small shapes consistent with BYOL projector/predictor outputs: (batch, hidden)
    N, D = 8, 128
    p1 = jax.random.normal(k1, (N, D), dtype=jnp.float32)
    z1 = jax.random.normal(k2, (N, D), dtype=jnp.float32)
    p2 = jax.random.normal(k3, (N, D), dtype=jnp.float32)
    z2 = jax.random.normal(k4, (N, D), dtype=jnp.float32)

    loss = byol_loss(p1, z1, p2, z2)
    jax.block_until_ready(loss)

    # Pure-JAX reference for sanity check.
    def ref_neg_cos(p, z):
        dot = jnp.sum(p * z, axis=-1)
        denom = (jnp.maximum(jnp.linalg.norm(p, axis=-1), _EPS)
                 * jnp.maximum(jnp.linalg.norm(z, axis=-1), _EPS))
        return -jnp.mean(dot / denom)

    ref = 0.5 * (ref_neg_cos(p1, z2) + ref_neg_cos(p2, z1))
    assert jnp.allclose(loss, ref, atol=1e-5, rtol=1e-5), (loss, ref)

    print("KERNEL_OK")
</pallas_src>

<mosaic_0001>
module attributes {stable_mosaic.version = 11 : i64} {
  func.func @kernel(%arg0: i32, %arg1: memref<8x128xf32, #tpu.memory_space<vmem>>, %arg2: memref<8x128xf32, #tpu.memory_space<vmem>>, %arg3: memref<8x128xf32, #tpu.memory_space<vmem>>, %arg4: memref<8x128xf32, #tpu.memory_space<vmem>>, %arg5: memref<1x1xf32, #tpu.memory_space<vmem>>, %arg6: memref<1x1xf32, #tpu.memory_space<vmem>>) attributes {dimension_semantics = [#tpu.dimension_semantics<arbitrary>], iteration_bounds = array<i64: 1>, scalar_prefetch = 0 : i64, scratch_operands = 1 : i64, tpu.core_type = #tpu.core_type<tc>, window_params = [{transform_indices = @transform_0, window_bounds = array<i64: 8, 128>}, {transform_indices = @transform_1, window_bounds = array<i64: 8, 128>}, {transform_indices = @transform_2, window_bounds = array<i64: 8, 128>}, {transform_indices = @transform_3, window_bounds = array<i64: 8, 128>}, {pipeline_mode = #tpu.pipeline_mode<synchronous>, transform_indices = @transform_4, window_bounds = array<i64: 1, 1>}]} {
    %c0_i32 = arith.constant 0 : i32
    %0 = arith.cmpi eq, %arg0, %c0_i32 : i32
    %1 = arith.extui %0 : i1 to i32
    %c0_i32_0 = arith.constant 0 : i32
    %2 = arith.cmpi ne, %1, %c0_i32_0 : i32
    scf.if %2 {
      %cst_24 = arith.constant 0.000000e+00 : f32
      %48 = vector.broadcast %cst_24 : f32 to vector<1x1xf32>
      %c0_25 = arith.constant 0 : index
      %c0_26 = arith.constant 0 : index
      %49 = vector.load %arg6[%c0_25, %c0_26] : memref<1x1xf32, #tpu.memory_space<vmem>>, vector<1x1xf32>
      tpu.vector_store %arg6[%c0_25, %c0_26], %48 {strides = array<i32>} : memref<1x1xf32, #tpu.memory_space<vmem>>, vector<1x1xf32>,
    } else {
    }
    %c0 = arith.constant 0 : index
    %c0_1 = arith.constant 0 : index
    %3 = vector.load %arg1[%c0, %c0_1] : memref<8x128xf32, #tpu.memory_space<vmem>>, vector<8x128xf32>
    %c0_2 = arith.constant 0 : index
    %c0_3 = arith.constant 0 : index
    %4 = vector.load %arg2[%c0_2, %c0_3] : memref<8x128xf32, #tpu.memory_space<vmem>>, vector<8x128xf32>
    %5 = arith.mulf %3, %4 : vector<8x128xf32>
    %cst = arith.constant dense<0.000000e+00> : vector<8xf32>
    %6 = vector.multi_reduction <add>, %5, %cst [1] : vector<8x128xf32> to vector<8xf32>
    %7 = vector.shape_cast %6 : vector<8xf32> to vector<8x1xf32>
    %8 = arith.mulf %3, %3 : vector<8x128xf32>
    %cst_4 = arith.constant dense<0.000000e+00> : vector<8xf32>
    %9 = vector.multi_reduction <add>, %8, %cst_4 [1] : vector<8x128xf32> to vector<8xf32>
    %10 = vector.shape_cast %9 : vector<8xf32> to vector<8x1xf32>
    %11 = arith.mulf %4, %4 : vector<8x128xf32>
    %cst_5 = arith.constant dense<0.000000e+00> : vector<8xf32>
    %12 = vector.multi_reduction <add>, %11, %cst_5 [1] : vector<8x128xf32> to vector<8xf32>
    %13 = vector.shape_cast %12 : vector<8xf32> to vector<8x1xf32>
    %cst_6 = arith.constant 1.000000e-16 : f32
    %14 = vector.broadcast %cst_6 : f32 to vector<8x1xf32>
    %15 = arith.maximumf %10, %14 : vector<8x1xf32>
    %cst_7 = arith.constant 1.000000e-16 : f32
    %16 = vector.broadcast %cst_7 : f32 to vector<8x1xf32>
    %17 = arith.maximumf %13, %16 : vector<8x1xf32>
    %18 = arith.mulf %15, %17 : vector<8x1xf32>
    %19 = math.rsqrt %18 : vector<8x1xf32>
    %20 = arith.mulf %7, %19 : vector<8x1xf32>
    %c0_8 = arith.constant 0 : index
    %c0_9 = arith.constant 0 : index
    %21 = vector.load %arg3[%c0_8, %c0_9] : memref<8x128xf32, #tpu.memory_space<vmem>>, vector<8x128xf32>
    %c0_10 = arith.constant 0 : index
    %c0_11 = arith.constant 0 : index
    %22 = vector.load %arg4[%c0_10, %c0_11] : memref<8x128xf32, #tpu.memory_space<vmem>>, vector<8x128xf32>
    %23 = arith.mulf %21, %22 : vector<8x128xf32>
    %cst_12 = arith.constant dense<0.000000e+00> : vector<8xf32>
    %24 = vector.multi_reduction <add>, %23, %cst_12 [1] : vector<8x128xf32> to vector<8xf32>
    %25 = vector.shape_cast %24 : vector<8xf32> to vector<8x1xf32>
    %26 = arith.mulf %21, %21 : vector<8x128xf32>
    %cst_13 = arith.constant dense<0.000000e+00> : vector<8xf32>
    %27 = vector.multi_reduction <add>, %26, %cst_13 [1] : vector<8x128xf32> to vector<8xf32>
    %28 = vector.shape_cast %27 : vector<8xf32> to vector<8x1xf32>
    %29 = arith.mulf %22, %22 : vector<8x128xf32>
    %cst_14 = arith.constant dense<0.000000e+00> : vector<8xf32>
    %30 = vector.multi_reduction <add>, %29, %cst_14 [1] : vector<8x128xf32> to vector<8xf32>
    %31 = vector.shape_cast %30 : vector<8xf32> to vector<8x1xf32>
    %cst_15 = arith.constant 1.000000e-16 : f32
    %32 = vector.broadcast %cst_15 : f32 to vector<8x1xf32>
    %33 = arith.maximumf %28, %32 : vector<8x1xf32>
    %cst_16 = arith.constant 1.000000e-16 : f32
    %34 = vector.broadcast %cst_16 : f32 to vector<8x1xf32>
    %35 = arith.maximumf %31, %34 : vector<8x1xf32>
    %36 = arith.mulf %33, %35 : vector<8x1xf32>
    %37 = math.rsqrt %36 : vector<8x1xf32>
    %38 = arith.mulf %25, %37 : vector<8x1xf32>
    %39 = arith.addf %20, %38 : vector<8x1xf32>
    %c0_17 = arith.constant 0 : index
    %c0_18 = arith.constant 0 : index
    %40 = vector.load %arg6[%c0_17, %c0_18] : memref<1x1xf32, #tpu.memory_space<vmem>>, vector<1x1xf32>
    %cst_19 = arith.constant dense<0.000000e+00> : vector<1xf32>
    %41 = vector.multi_reduction <add>, %39, %cst_19 [0] : vector<8x1xf32> to vector<1xf32>
    %42 = vector.shape_cast %41 : vector<1xf32> to vector<1x1xf32>
    %43 = arith.addf %40, %42 : vector<1x1xf32>
    %c0_20 = arith.constant 0 : index
    %c0_21 = arith.constant 0 : index
    %44 = vector.load %arg6[%c0_20, %c0_21] : memref<1x1xf32, #tpu.memory_space<vmem>>, vector<1x1xf32>
    tpu.vector_store %arg6[%c0_20, %c0_21], %43 {strides = array<i32>} : memref<1x1xf32, #tpu.memory_space<vmem>>, vector<1x1xf32>,
    %c0_i32_22 = arith.constant 0 : i32
    %45 = arith.cmpi eq, %arg0, %c0_i32_22 : i32
    %46 = arith.extui %45 : i1 to i32
    %c0_i32_23 = arith.constant 0 : i32
    %47 = arith.cmpi ne, %46, %c0_i32_23 : i32
    scf.if %47 {
      %c0_24 = arith.constant 0 : index
      %c0_25 = arith.constant 0 : index
      %48 = vector.load %arg6[%c0_24, %c0_25] : memref<1x1xf32, #tpu.memory_space<vmem>>, vector<1x1xf32>
      %cst_26 = arith.constant -6.250000e-02 : f32
      %49 = vector.broadcast %cst_26 : f32 to vector<1x1xf32>
      %50 = arith.mulf %48, %49 : vector<1x1xf32>
      %c0_27 = arith.constant 0 : index
      %c0_28 = arith.constant 0 : index
      %51 = vector.load %arg5[%c0_27, %c0_28] : memref<1x1xf32, #tpu.memory_space<vmem>>, vector<1x1xf32>
      tpu.vector_store %arg5[%c0_27, %c0_28], %50 {strides = array<i32>} : memref<1x1xf32, #tpu.memory_space<vmem>>, vector<1x1xf32>,
    } else {
    }
    return
  }
  func.func @transform_0(%arg0: i32) -> (i32, i32) {
    %c0_i32 = arith.constant 0 : i32
    %c0_i32_0 = arith.constant 0 : i32
    return %arg0, %c0_i32 : i32, i32
  }
  func.func @transform_1(%arg0: i32) -> (i32, i32) {
    %c0_i32 = arith.constant 0 : i32
    %c0_i32_0 = arith.constant 0 : i32
    return %arg0, %c0_i32 : i32, i32
  }
  func.func @transform_2(%arg0: i32) -> (i32, i32) {
    %c0_i32 = arith.constant 0 : i32
    %c0_i32_0 = arith.constant 0 : i32
    return %arg0, %c0_i32 : i32, i32
  }
  func.func @transform_3(%arg0: i32) -> (i32, i32) {
    %c0_i32 = arith.constant 0 : i32
    %c0_i32_0 = arith.constant 0 : i32
    return %arg0, %c0_i32 : i32, i32
  }
  func.func @transform_4(%arg0: i32) -> (i32, i32) {
    %c0_i32 = arith.constant 0 : i32
    %c0_i32_0 = arith.constant 0 : i32
    %c0_i32_1 = arith.constant 0 : i32
    return %c0_i32, %c0_i32_0 : i32, i32
  }
}

</mosaic_0001>

<bundles_post_ra>
// kernel: tpu_custom_call.1
= control target key start
LH: loop header
LB: loop body
LE: loop exit
PB: predicated region body
PF: predicated region fallthrough
CT: control target
= control target key end

     0   :  { %9 = vsyncpa [#allocation4], 0  ;;  %s304_s0 = inlined_call_operand.hbm [shape: f32[8,128], index: 0, kind: input, shape index: {}]   ;;  %s305_s1 = inlined_call_operand.hbm [shape: f32[8,128], index: 1, kind: input, shape index: {}]   ;;  %s306_s2 = inlined_call_operand.hbm [shape: f32[8,128], index: 2, kind: input, shape index: {}]   ;;  %s307_s3 = inlined_call_operand.hbm [shape: f32[8,128], index: 3, kind: input, shape index: {}]   ;;  %s308_s4 = inlined_call_operand.hbm [shape: f32[1,1], index: 4, kind: output, shape index: {}]  }
   0x1   :  { %10 = vsyncpa [#allocation7], 0 }
   0x2   :  { %11 = vsyncpa [#allocation10], 0 }
   0x3   :  { %12 = vsyncpa [#allocation5], 0  ;;  %s255_s15 = smov [#allocation6]   ;;  %s256_s17 = smov [#allocation3]  }
   0x4   :  { %s29_s16 = sshll.u32 %s255_s15, 4  ;;  %s19_s18 = sshll.u32 %s256_s17, 4  ;;  %s30_s16 = int_to_ptr.vmem [resolvable:$true] %s29_s16  ;;  %s20_s18 = int_to_ptr.vmem [resolvable:$true] %s19_s18 }
   0x5   :  { %s155_s19 = scalar_lea.vmem %s30_s16, 128  ;;  %p160_p1 = scmp.lt.s32.totalorder %s30_s16, %s30_s16 }
   0x6   :  { %p156_p0 = scmp.ne.s32.totalorder %s30_s16, %s155_s19  ;;  %p161_p2 = scmp.lt.s32.totalorder %s155_s19, %s155_s19 }
   0x8   :  { %p162_p3 = por %p161_p2, %p160_p1 }
   0xa   :  { %p163_p4 = pnand %p162_p3, %p156_p0 }
   0xc   :  { %166 = shalt.err (!%p163_p4)
}
   0xd   :  { %32 = dma.hbm_to_vmem [thread:$0]  %s305_s1, 128, %s30_s16, [#allocation7]  }
   0xe   :  { %s175_s22 = scalar_lea.vmem %s20_s18, 128  ;;  %p180_p6 = scmp.lt.s32.totalorder %s20_s18, %s20_s18 }
   0xf   :  { %p176_p5 = scmp.ne.s32.totalorder %s20_s18, %s175_s22  ;;  %p181_p7 = scmp.lt.s32.totalorder %s175_s22, %s175_s22 }
  0x11   :  { %p182_p8 = por %p181_p7, %p180_p6 }
  0x13   :  { %p183_p9 = pnand %p182_p8, %p176_p5 }
  0x15   :  { %186 = shalt.err (!%p183_p9)
}
  0x16   :  { %22 = dma.hbm_to_vmem [thread:$0]  %s304_s0, 128, %s20_s18, [#allocation4]  }
  0x17   :  { %s257_s25 = smov [#allocation8]   ;;  %s258_s27 = smov [#allocation9]  }
  0x18   :  { %s39_s26 = sshll.u32 %s257_s25, 4  ;;  %s49_s28 = sshll.u32 %s258_s27, 4  ;;  %s40_s26 = int_to_ptr.vmem [resolvable:$true] %s39_s26  ;;  %s50_s28 = int_to_ptr.vmem [resolvable:$true] %s49_s28 }
  0x19   :  { %s195_s29 = scalar_lea.vmem %s40_s26, 128  ;;  %p200_p11 = scmp.lt.s32.totalorder %s40_s26, %s40_s26 }
  0x1a   :  { %p196_p10 = scmp.ne.s32.totalorder %s40_s26, %s195_s29  ;;  %p201_p12 = scmp.lt.s32.totalorder %s195_s29, %s195_s29 }
  0x1c   :  { %p202_p13 = por %p201_p12, %p200_p11 }
  0x1e   :  { %p203_p0 = pnand %p202_p13, %p196_p10 }
  0x20   :  { %206 = shalt.err (!%p203_p0)
}
  0x21   :  { %42 = dma.hbm_to_vmem [thread:$0]  %s306_s2, 128, %s40_s26, [#allocation7]  }
  0x22   :  { %s215_s5 = scalar_lea.vmem %s50_s28, 128  ;;  %p220_p2 = scmp.lt.s32.totalorder %s50_s28, %s50_s28 }
  0x23   :  { %p216_p1 = scmp.ne.s32.totalorder %s50_s28, %s215_s5  ;;  %p221_p3 = scmp.lt.s32.totalorder %s215_s5, %s215_s5 }
  0x25   :  { %p222_p4 = por %p221_p3, %p220_p2 }
  0x27   :  { %p223_p5 = pnand %p222_p4, %p216_p1 }
  0x29   :  { %226 = shalt.err (!%p223_p5)
}
  0x2a   :  { %52 = dma.hbm_to_vmem [thread:$0]  %s307_s3, 128, %s50_s28, [#allocation10]  }
  0x2b   :  { %247 = dma.done.wait [#allocation4], 128  }
  0x2c   :  { %248 = vsyncadd [#allocation4], 4294967168 }
  0x2d   :  { %249 = dma.done.wait [#allocation7], 256  }
  0x2e   :  { %250 = vsyncadd [#allocation7], 4294967040 }
  0x2f   :  { %251 = dma.done.wait [#allocation10], 128  }
  0x30   :  { %252 = vsyncadd [#allocation10], 4294967168  ;;  %v87_v0 = vld [vmem:[#allocation8] sm:$0xff]  ;;  %v71_v1 = vld [vmem:[#allocation3] sm:$0xff]  ;;  %vm69_vm0 = vcmask 0   ;;  %v259_v10 = vmov 0.0  }
  0x31   :  { %v88_v2 = vld [vmem:[#allocation9] sm:$0xff]  ;;  %v92_v3 = vmul.f32 %v87_v0, %v87_v0  ;;  %v76_v4 = vmul.f32 %v71_v1, %v71_v1  ;;  %v72_v5 = vld [vmem:[#allocation6] sm:$0xff]  ;;  %70 = vst.msk [vmem:[#allocation2] sm:$0x1] %vm69_vm0, %v259_v10  ;;  %s260_s2 = smov [#allocation11]  }
  0x32   :  { %v95_v6 = vmul.f32 %v88_v2, %v88_v2  ;;  %v79_v7 = vmul.f32 %v72_v5, %v72_v5  ;;  %v89_v8 = vmul.f32 %v88_v2, %v87_v0  ;;  %v73_v9 = vmul.f32 %v72_v5, %v71_v1  ;;  %s126_s3 = sshll.u32 %s260_s2, 4  ;;  %s127_s3 = int_to_ptr.vmem [resolvable:$true] %s126_s3 }
  0x33   :  { %93 = vadd.xlane.f32.xlu1 %v92_v3  ;;  %77 = vadd.xlane.f32.xlu0 %v76_v4  ;;  %s227_s7 = scalar_lea.vmem %s127_s3, 16  ;;  %s231_s8 = scalar_lea.vmem %s127_s3, 32 }
  0x34   :  { %p228_p6 = scmp.ne.s32.totalorder %s127_s3, %s227_s7  ;;  %p232_p7 = scmp.lt.s32.totalorder %s127_s3, %s127_s3 }
  0x35   :  { %p233_p8 = scmp.lt.s32.totalorder %s231_s8, %s227_s7 }
  0x37   :  { %96 = vadd.xlane.f32.xlu1 %v95_v6  ;;  %80 = vadd.xlane.f32.xlu0 %v79_v7  ;;  %p234_p9 = por %p233_p8, %p232_p7 }
  0x38   :  { %v104_v33 = vld [vmem:[#allocation2] sm:$0x1] }
  0x39   :  { %p235_p10 = pnand %p234_p9, %p228_p6 }
  0x3b   :  { %90 = vadd.xlane.f32.xlu1 %v89_v8  ;;  %74 = vadd.xlane.f32.xlu0 %v73_v9 }
  0xbc   :  { %v94_v11 = vpop.xlane.xlu1 %93  ;;  %v78_v12 = vpop.xlane.xlu0 %77 }
  0xbd   :  { %v98_v13 = vmax.f32 %v94_v11, 1e-16  ;;  %v82_v16 = vmax.f32 %v78_v12, 1e-16 }
  0xc0   :  { %v97_v14 = vpop.xlane.xlu1 %96  ;;  %v81_v15 = vpop.xlane.xlu0 %80 }
  0xc1   :  { %v99_v17 = vmax.f32 %v97_v14, 1e-16  ;;  %v83_v18 = vmax.f32 %v81_v15, 1e-16 }
  0xc3   :  { %v100_v19 = vmul.f32 %v99_v17, %v98_v13  ;;  %v84_v20 = vmul.f32 %v83_v18, %v82_v16 }
  0xc4   :  { %v91_v21 = vpop.xlane.xlu1 %90  ;;  %v75_v22 = vpop.xlane.xlu0 %74 }
  0xc5   :  { %143 = vrsqrt.f32 %v100_v19 }
  0xc6   :  { %145 = vrsqrt.f32 %v84_v20 }
  0xd2   :  { %v144_v23 = vpop.eup %143 }
  0xd3   :  { %v146_v24 = vpop.eup %145  ;;  %v102_v25 = vmul.f32 %v144_v23, %v91_v21 }
  0xd4   :  { %v86_v26 = vmul.f32 %v146_v24, %v75_v22 }
  0xd6   :  { %v103_v27 = vadd.f32 %v102_v25, %v86_v26 }
  0xd8   :  { %v105_v28 = vrot.slane %v103_v27, 4 }
  0xda   :  { %v106_v29 = vadd.f32 %v105_v28, %v103_v27 }
  0xdc   :  { %v107_v30 = vrot.slane %v106_v29, 2 }
  0xde   :  { %v108_v31 = vadd.f32 %v107_v30, %v106_v29 }
  0xe0   :  { %v109_v32 = vrot.slane %v108_v31, 1 }
  0xe2   :  { %v110_v34 = vadd.f32 %v109_v32, %v108_v31 }
  0xe4   :  { %v111_v35 = vadd.f32 %v110_v34, %v104_v33 }
  0xe6   :  { %113 = vst.msk [vmem:[#allocation2] sm:$0x1] %vm69_vm0, %v111_v35 }
  0xed   :  { %v117_v36 = vld [vmem:[#allocation2] sm:$0x1] }
  0xee   :  { %v118_v37 = vmul.f32 -0.0625, %v117_v36 }
  0xf0   :  { %119 = vst.msk [vmem:[#allocation11] sm:$0x1] %vm69_vm0, %v118_v37 }
  0xf1   :  { %238 = shalt.err (!%p235_p10)
}
  0xf2   :  { %129 = dma.vmem_to_hbm [thread:$0]  %s127_s3, 16, %s308_s4, [#allocation5]  }
  0xf3   :  { %253 = dma.done.wait [#allocation5], 16  }
  0xf4   :  { %254 = vsyncadd [#allocation5], 4294967280 }
  0xf5   :  { %133 = vsyncpa [#allocation4], 1 }
  0xf6   :  { %134 = vsyncpa [#allocation7], 1 }
  0xf7   :  { %135 = vsyncpa [#allocation10], 1 }
  0xf8   :  { %136 = vsyncpa [#allocation5], 1 }

</bundles_post_ra>
